<compile_context>
chip_gen: v5e
topology: v5e:2x2
jax: 0.10.0
libtpu: 0.0.40
codegen_flags: <defaults>
</compile_context>

<pallas_src>
import functools

import jax
import jax.numpy as jnp
from jax.experimental import pallas as pl
from jax.experimental.pallas import tpu as pltpu

EPS = 1e-5  # nn.LayerNorm default


def _round_up(x, m):
    return (x + m - 1) // m * m


def _prenorm_linear_kernel(x_ref, g_ref, b_ref, w_ref, bias_ref, o_ref, y_ref):
    # Grid: (row_tiles, h_tiles); rows "parallel", H "arbitrary" (sequential).
    # LayerNorm + affine computed once per row tile (j == 0) into bf16 scratch.
    @pl.when(pl.program_id(1) == 0)
    def _():
        x = x_ref[...].astype(jnp.float32)
        mean = jnp.mean(x, axis=-1, keepdims=True)
        mean_sq = jnp.mean(x * x, axis=-1, keepdims=True)
        var = jnp.maximum(mean_sq - mean * mean, 0.0)   # one-pass, clamp fp error
        xhat = (x - mean) * jax.lax.rsqrt(var + EPS)
        y = xhat * g_ref[...] + b_ref[...]              # gamma/beta f32 (1, D)
        y_ref[...] = y.astype(jnp.bfloat16)

    # MXU: bf16 operands (cached LN output x bf16 W), f32 accumulation.
    out = jnp.dot(y_ref[...], w_ref[...], preferred_element_type=jnp.float32)
    out = out + bias_ref[...]                           # f32 bias tile
    o_ref[...] = out.astype(o_ref.dtype)


def _select_tiles(rows, D, H, x_itemsize):
    """Generation-aware tile sizes + VMEM limit (static, pure Python)."""
    try:
        vmem_cap = int(pltpu.get_tpu_info().vmem_capacity_bytes)
    except Exception:
        vmem_cap = 64 * 1024 * 1024                      # safe for all chips
    budget = max(vmem_cap - 16 * 1024 * 1024, 16 * 1024 * 1024)

    # Lane-dense output tiles, multiple of 128.
    tile_h = min(512, _round_up(H, 128))
    # Row tile: big on 128-MiB-VMEM chips (v5e/v6e) to hide W re-streaming,
    # moderate on v7x (64 MiB VMEM).
    pref_rows = 1024 if vmem_cap >= 100 * 1024 * 1024 else 512
    tile_rows = min(pref_rows, _round_up(rows, 8))

    def footprint(tm, th):
        return (2 * tm * D * x_itemsize            # x tile, double-buffered
                + 2 * D * th * 2                   # bf16 W tile, double-buffered
                + 2 * (2 * D * 4 + th * 4)         # gamma/beta/bias
                + 2 * tm * th * x_itemsize         # out tile, double-buffered
                + tm * D * 2)                      # cached LN output (bf16)

    # Shrink tile_h first (W traffic depends only on tile_rows), then tile_rows.
    while footprint(tile_rows, tile_h) > budget and tile_h > 128:
        tile_h = max(128, _round_up(tile_h // 2, 128))
    while footprint(tile_rows, tile_h) > budget and tile_rows > 8:
        tile_rows = max(8, _round_up(tile_rows // 2, 8))

    vmem_limit = int(min(max(footprint(tile_rows, tile_h) + 4 * 1024 * 1024,
                             32 * 1024 * 1024),
                         budget))
    return tile_rows, tile_h, vmem_limit


@functools.partial(jax.jit, static_argnames=("tile_rows", "tile_h", "vmem_limit"))
def _prenorm_linear_impl(x, gamma, beta, w, bias, *, tile_rows, tile_h, vmem_limit):
    B, S, D = x.shape
    H = w.shape[1]
    rows = B * S
    rows_p = _round_up(rows, tile_rows)
    h_p = _round_up(H, tile_h)

    # Wrapper-side layout plumbing: flatten rows, pad rows/H, bf16 weights.
    x2 = x.reshape(rows, D)
    if rows_p != rows:
        x2 = jnp.pad(x2, ((0, rows_p - rows), (0, 0)))
    g2 = gamma.astype(jnp.float32).reshape(1, D)
    b2 = beta.astype(jnp.float32).reshape(1, D)
    w2 = w.astype(jnp.bfloat16)
    bias2 = bias.astype(jnp.float32).reshape(1, H)
    if h_p != H:
        w2 = jnp.pad(w2, ((0, 0), (0, h_p - H)))
        bias2 = jnp.pad(bias2, ((0, 0), (0, h_p - H)))

    out2 = pl.pallas_call(
        _prenorm_linear_kernel,
        out_shape=jax.ShapeDtypeStruct((rows_p, h_p), x.dtype),
        grid_spec=pltpu.PrefetchScalarGridSpec(
            num_scalar_prefetch=0,
            grid=(rows_p // tile_rows, h_p // tile_h),
            in_specs=[
                pl.BlockSpec((tile_rows, D), lambda i, j: (i, 0)),   # x rows
                pl.BlockSpec((1, D), lambda i, j: (0, 0)),           # gamma
                pl.BlockSpec((1, D), lambda i, j: (0, 0)),           # beta
                pl.BlockSpec((D, tile_h), lambda i, j: (0, j)),      # W cols
                pl.BlockSpec((1, tile_h), lambda i, j: (0, j)),      # bias
            ],
            out_specs=pl.BlockSpec((tile_rows, tile_h), lambda i, j: (i, j)),
            scratch_shapes=[pltpu.VMEM((tile_rows, D), jnp.bfloat16)],  # cached LN
        ),
        compiler_params=pltpu.CompilerParams(
            dimension_semantics=("parallel", "arbitrary"),
            vmem_limit_bytes=vmem_limit,
        ),
    )(x2, g2, b2, w2, bias2)

    return out2[:rows, :H].reshape(B, S, H)


def prenorm_linear(x, gamma, beta, w, bias, *, tile_rows=None, tile_h=None):
    """PreNorm(dim, Linear(dim, H)).forward(x): x (B, S, D) -> (B, S, H)."""
    B, S, D = x.shape
    H = w.shape[1]
    tr, th, vmem_limit = _select_tiles(B * S, D, H, jnp.dtype(x.dtype).itemsize)
    if tile_rows is not None:
        tr = tile_rows
    if tile_h is not None:
        th = tile_h
    return _prenorm_linear_impl(x, gamma, beta, w, bias,
                                tile_rows=tr, tile_h=th, vmem_limit=vmem_limit)


def _reference(x, gamma, beta, w, bias):
    # Matched-precision reference: f32 LayerNorm, bf16 matmul operands,
    # f32 accumulation — same numerics as the kernel.
    xf = x.astype(jnp.float32)
    mean = jnp.mean(xf, axis=-1, keepdims=True)
    var = jnp.mean((xf - mean) ** 2, axis=-1, keepdims=True)
    xhat = (xf - mean) * jax.lax.rsqrt(var + EPS)
    y = xhat * gamma.astype(jnp.float32) + beta.astype(jnp.float32)
    out = jnp.dot(y.astype(jnp.bfloat16), w.astype(jnp.bfloat16),
                  preferred_element_type=jnp.float32)
    return (out + bias.astype(jnp.float32)).astype(x.dtype)


if __name__ == "__main__":
    key = jax.random.PRNGKey(0)
    B, S, D, H = 2, 8, 32, 32

    kx, kw, kb = jax.random.split(key, 3)
    x = jax.random.normal(kx, (B, S, D), dtype=jnp.float32)

    # nn.LayerNorm init: gamma=1, beta=0; Linear: small random weights + bias.
    gamma = jnp.ones((D,), dtype=jnp.float32)
    beta = jnp.zeros((D,), dtype=jnp.float32)
    w = jax.random.normal(kw, (D, H), dtype=jnp.float32) * (1.0 / jnp.sqrt(D))
    bias = jax.random.normal(kb, (H,), dtype=jnp.float32) * 0.01

    out = prenorm_linear(x, gamma, beta, w, bias)
    out = jax.block_until_ready(out)

    ref = _reference(x, gamma, beta, w, bias)
    assert out.shape == (B, S, H)
    assert jnp.allclose(out, ref, atol=1e-3, rtol=1e-3), "mismatch vs reference"

    print("KERNEL_OK")
</pallas_src>

<mosaic_0001>
module attributes {stable_mosaic.version = 11 : i64} {
  func.func @_prenorm_linear_kernel(%arg0: i32, %arg1: i32, %arg2: memref<16x32xf32, #tpu.memory_space<vmem>>, %arg3: memref<1x32xf32, #tpu.memory_space<vmem>>, %arg4: memref<1x32xf32, #tpu.memory_space<vmem>>, %arg5: memref<32x128xbf16, #tpu.memory_space<vmem>>, %arg6: memref<1x128xf32, #tpu.memory_space<vmem>>, %arg7: memref<16x128xf32, #tpu.memory_space<vmem>>, %arg8: memref<16x32xbf16, #tpu.memory_space<vmem>>) attributes {dimension_semantics = [#tpu.dimension_semantics<parallel>, #tpu.dimension_semantics<arbitrary>], iteration_bounds = array<i64: 1, 1>, scalar_prefetch = 0 : i64, scratch_operands = 1 : i64, tpu.core_type = #tpu.core_type<tc>, window_params = [{transform_indices = @transform_0, window_bounds = array<i64: 16, 32>}, {pipeline_mode = #tpu.pipeline_mode<synchronous>, transform_indices = @transform_1, window_bounds = array<i64: 1, 32>}, {pipeline_mode = #tpu.pipeline_mode<synchronous>, transform_indices = @transform_2, window_bounds = array<i64: 1, 32>}, {transform_indices = @transform_3, window_bounds = array<i64: 32, 128>}, {transform_indices = @transform_4, window_bounds = array<i64: 1, 128>}, {transform_indices = @transform_5, window_bounds = array<i64: 16, 128>}]} {
    %c0_i32 = arith.constant 0 : i32
    %0 = arith.cmpi eq, %arg1, %c0_i32 : i32
    %1 = arith.extui %0 : i1 to i32
    %c0_i32_0 = arith.constant 0 : i32
    %2 = arith.cmpi ne, %1, %c0_i32_0 : i32
    scf.if %2 {
      %c0_8 = arith.constant 0 : index
      %c0_9 = arith.constant 0 : index
      %10 = vector.load %arg2[%c0_8, %c0_9] : memref<16x32xf32, #tpu.memory_space<vmem>>, vector<16x32xf32>
      %cst_10 = arith.constant dense<0.000000e+00> : vector<16xf32>
      %11 = vector.multi_reduction <add>, %10, %cst_10 [1] : vector<16x32xf32> to vector<16xf32>
      %12 = vector.shape_cast %11 : vector<16xf32> to vector<16x1xf32>
      %cst_11 = arith.constant 3.200000e+01 : f32
      %13 = vector.broadcast %cst_11 : f32 to vector<16x1xf32>
      %14 = arith.divf %12, %13 : vector<16x1xf32>
      %15 = arith.mulf %10, %10 : vector<16x32xf32>
      %cst_12 = arith.constant dense<0.000000e+00> : vector<16xf32>
      %16 = vector.multi_reduction <add>, %15, %cst_12 [1] : vector<16x32xf32> to vector<16xf32>
      %17 = vector.shape_cast %16 : vector<16xf32> to vector<16x1xf32>
      %cst_13 = arith.constant 3.200000e+01 : f32
      %18 = vector.broadcast %cst_13 : f32 to vector<16x1xf32>
      %19 = arith.divf %17, %18 : vector<16x1xf32>
      %20 = arith.mulf %14, %14 : vector<16x1xf32>
      %21 = arith.subf %19, %20 : vector<16x1xf32>
      %cst_14 = arith.constant 0.000000e+00 : f32
      %22 = vector.broadcast %cst_14 : f32 to vector<16x1xf32>
      %23 = arith.maximumf %21, %22 : vector<16x1xf32>
      %24 = vector.broadcast %14 : vector<16x1xf32> to vector<16x32xf32>
      %25 = arith.subf %10, %24 : vector<16x32xf32>
      %cst_15 = arith.constant 9.99999974E-6 : f32
      %26 = vector.broadcast %cst_15 : f32 to vector<16x1xf32>
      %27 = arith.addf %23, %26 : vector<16x1xf32>
      %28 = math.rsqrt %27 : vector<16x1xf32>
      %29 = vector.broadcast %28 : vector<16x1xf32> to vector<16x32xf32>
      %30 = arith.mulf %25, %29 : vector<16x32xf32>
      %c0_16 = arith.constant 0 : index
      %c0_17 = arith.constant 0 : index
      %31 = vector.load %arg3[%c0_16, %c0_17] : memref<1x32xf32, #tpu.memory_space<vmem>>, vector<1x32xf32>
      %32 = vector.broadcast %31 : vector<1x32xf32> to vector<16x32xf32>
      %33 = arith.mulf %30, %32 : vector<16x32xf32>
      %c0_18 = arith.constant 0 : index
      %c0_19 = arith.constant 0 : index
      %34 = vector.load %arg4[%c0_18, %c0_19] : memref<1x32xf32, #tpu.memory_space<vmem>>, vector<1x32xf32>
      %35 = vector.broadcast %34 : vector<1x32xf32> to vector<16x32xf32>
      %36 = arith.addf %33, %35 : vector<16x32xf32>
      %37 = arith.truncf %36 : vector<16x32xf32> to vector<16x32xbf16>
      %c0_20 = arith.constant 0 : index
      %c0_21 = arith.constant 0 : index
      %38 = vector.load %arg8[%c0_20, %c0_21] : memref<16x32xbf16, #tpu.memory_space<vmem>>, vector<16x32xbf16>
      tpu.vector_store %arg8[%c0_20, %c0_21], %37 {strides = array<i32>} : memref<16x32xbf16, #tpu.memory_space<vmem>>, vector<16x32xbf16>,
    } else {
    }
    %c0 = arith.constant 0 : index
    %c0_1 = arith.constant 0 : index
    %3 = vector.load %arg8[%c0, %c0_1] : memref<16x32xbf16, #tpu.memory_space<vmem>>, vector<16x32xbf16>
    %c0_2 = arith.constant 0 : index
    %c0_3 = arith.constant 0 : index
    %4 = vector.load %arg5[%c0_2, %c0_3] : memref<32x128xbf16, #tpu.memory_space<vmem>>, vector<32x128xbf16>
    %cst = arith.constant dense<0.000000e+00> : vector<16x128xf32>
    %5 = tpu.matmul %3, %4, %cst {dimension_numbers = #tpu.dot_dimension_numbers<[1], [0], [0], [1], [0, 0, 1, 1], [], []>} : vector<16x32xbf16>, vector<32x128xbf16>, vector<16x128xf32> -> vector<16x128xf32>
    %c0_4 = arith.constant 0 : index
    %c0_5 = arith.constant 0 : index
    %6 = vector.load %arg6[%c0_4, %c0_5] : memref<1x128xf32, #tpu.memory_space<vmem>>, vector<1x128xf32>
    %7 = vector.broadcast %6 : vector<1x128xf32> to vector<16x128xf32>
    %8 = arith.addf %5, %7 : vector<16x128xf32>
    %c0_6 = arith.constant 0 : index
    %c0_7 = arith.constant 0 : index
    %9 = vector.load %arg7[%c0_6, %c0_7] : memref<16x128xf32, #tpu.memory_space<vmem>>, vector<16x128xf32>
    tpu.vector_store %arg7[%c0_6, %c0_7], %8 {strides = array<i32>} : memref<16x128xf32, #tpu.memory_space<vmem>>, vector<16x128xf32>,
    return
  }
  func.func @transform_0(%arg0: i32, %arg1: i32) -> (i32, i32) {
    %c0_i32 = arith.constant 0 : i32
    %c0_i32_0 = arith.constant 0 : i32
    return %arg0, %c0_i32 : i32, i32
  }
  func.func @transform_1(%arg0: i32, %arg1: i32) -> (i32, i32) {
    %c0_i32 = arith.constant 0 : i32
    %c0_i32_0 = arith.constant 0 : i32
    %c0_i32_1 = arith.constant 0 : i32
    return %c0_i32, %c0_i32_0 : i32, i32
  }
  func.func @transform_2(%arg0: i32, %arg1: i32) -> (i32, i32) {
    %c0_i32 = arith.constant 0 : i32
    %c0_i32_0 = arith.constant 0 : i32
    %c0_i32_1 = arith.constant 0 : i32
    return %c0_i32, %c0_i32_0 : i32, i32
  }
  func.func @transform_3(%arg0: i32, %arg1: i32) -> (i32, i32) {
    %c0_i32 = arith.constant 0 : i32
    %c0_i32_0 = arith.constant 0 : i32
    return %c0_i32, %arg1 : i32, i32
  }
  func.func @transform_4(%arg0: i32, %arg1: i32) -> (i32, i32) {
    %c0_i32 = arith.constant 0 : i32
    %c0_i32_0 = arith.constant 0 : i32
    return %c0_i32, %arg1 : i32, i32
  }
  func.func @transform_5(%arg0: i32, %arg1: i32) -> (i32, i32) {
    %c0_i32 = arith.constant 0 : i32
    return %arg0, %arg1 : i32, i32
  }
}

</mosaic_0001>

<bundles_post_ra>
// kernel: _prenorm_linear_impl.1
= control target key start
LH: loop header
LB: loop body
LE: loop exit
PB: predicated region body
PF: predicated region fallthrough
CT: control target
= control target key end

     0   :  { %vm27_vm0 = vcmask 261120   ;;  %v179_v8 = vmov 32.0   ;;  %vm99_vm6 = vcmask 257024   ;;  %s248_s0 = inlined_call_operand.vmem [shape: f32[16,32], index: 0, kind: input, shape index: {}]   ;;  %s249_s1 = inlined_call_operand.vmem [shape: f32[1,32], index: 1, kind: input, shape index: {}]   ;;  %s250_s2 = inlined_call_operand.vmem [shape: f32[1,32], index: 2, kind: input, shape index: {}]   ;;  %s251_s4 = inlined_call_operand.vmem [shape: f32[1,128], index: 4, kind: input, shape index: {}]   ;;  %s252_s3 = inlined_call_operand.vmem [shape: bf16[32,128], index: 3, kind: input, shape index: {}]   ;;  %s253_s5 = inlined_call_operand.vmem [shape: f32[16,128], index: 5, kind: output, shape index: {}]  }
   0x1   :  { %v25_v0 = vld [vmem:[%s248_s0] sm:$0xff]  ;;  %v217_v3 = vld [vmem:[%s248_s0 + $0x8] sm:$0xff]  ;;  %173 = vrcp.f32 %v179_v8 }
   0x2   :  { %v28_v1 = vsel %vm27_vm0, %v25_v0, 0.0  ;;  %v43_v2 = vmul.f32 %v25_v0, %v25_v0  ;;  %v44_v5 = vmul.f32 %v217_v3, %v217_v3  ;;  %v31_v6 = vsel %vm27_vm0, %v217_v3, 0.0  ;;  %v168_v29 = vld [vmem:[%s252_s3 + $0x8] sm:$0xff]  ;;  %v167_v31 = vld [vmem:[%s252_s3] sm:$0xff] }
   0x3   :  { %29 = vadd.xlane.f32.xlu0 %v28_v1  ;;  %139 = vmatpush.bf16.msra.mxu0 %v168_v29  ;;  %v170_v41 = vld [vmem:[%s249_s1] ss:$0 sm:$0xff] }
   0x4   :  { %v45_v4 = vsel %vm27_vm0, %v43_v2, 0.0  ;;  %v48_v7 = vsel %vm27_vm0, %v44_v5, 0.0  ;;  %v171_v44 = vld [vmem:[%s250_s2] ss:$0 sm:$0xff] }
   0x5   :  { %46 = vadd.xlane.f32.xlu1 %v45_v4  ;;  %v172_v60 = vld [vmem:[%s251_s4] ss:$0 sm:$0xff] }
   0x7   :  { %v174_v9 = vpop.eup %173  ;;  %140 = vmatpush.bf16.msra.mxu0 %v167_v31 }
   0x8   :  { %v35_v10 = vmul.f32 32.0, %v174_v9  ;;  %vm39_vm1 = vweird.f32 %v174_v9 }
   0xa   :  { %v36_v11 = vsub.f32 1.0, %v35_v10 }
   0xb   :  { %32 = vadd.xlane.f32.xlu0 %v31_v6 }
   0xc   :  { %v37_v12 = vmul.f32 %v174_v9, %v36_v11 }
   0xd   :  { %49 = vadd.xlane.f32.xlu1 %v48_v7 }
   0xe   :  { %v38_v13 = vadd.f32 %v174_v9, %v37_v12 }
  0x10   :  { %v40_v14 = vsel %vm39_vm1, %v174_v9, %v38_v13 }
  0x76   :  { %v30_v15 = vpop.xlane.xlu0 %29 }
  0x77   :  { %v41_v16 = vmul.f32 %v40_v14, %v30_v15 }
  0x78   :  { %v47_v17 = vpop.xlane.xlu1 %46 }
  0x79   :  { %v53_v18 = vmul.f32 %v41_v16, %v41_v16  ;;  %v51_v19 = vmul.f32 %v47_v17, %v40_v14  ;;  %v59_v40 = vsub.f32 %v25_v0, %v41_v16 }
  0x7b   :  { %v55_v20 = vsub.f32 %v51_v19, %v53_v18 }
  0x7d   :  { %v57_v21 = vmax.f32 %v55_v20, 0.0 }
  0x7e   :  { %v33_v22 = vpop.xlane.xlu0 %32 }
  0x7f   :  { %v61_v23 = vadd.f32 1e-05, %v57_v21  ;;  %v42_v24 = vmul.f32 %v40_v14, %v33_v22 }
  0x80   :  { %v50_v25 = vpop.xlane.xlu1 %49 }
  0x81   :  { %175 = vrsqrt.f32 %v61_v23  ;;  %v54_v26 = vmul.f32 %v42_v24, %v42_v24  ;;  %v52_v27 = vmul.f32 %v50_v25, %v40_v14  ;;  %vm69_vm3 = vweird.f32 %v61_v23 }
  0x82   :  { %v60_v53 = vsub.f32 %v217_v3, %v42_v24 }
  0x83   :  { %v56_v28 = vsub.f32 %v52_v27, %v54_v26 }
  0x85   :  { %v58_v30 = vmax.f32 %v56_v28, 0.0 }
  0x87   :  { %v176_v32 = vpop.eup %175  ;;  %v62_v34 = vadd.f32 1e-05, %v58_v30 }
  0x88   :  { %v64_v33 = vmul.f32 %v176_v32, %v61_v23  ;;  %vm70_vm2 = vweird.f32 %v176_v32 }
  0x89   :  { %177 = vrsqrt.f32 %v62_v34  ;;  %vm71_vm4 = vmor %vm69_vm3, %vm70_vm2  ;;  %vm79_vm7 = vweird.f32 %v62_v34 }
  0x8a   :  { %v65_v35 = vmul.f32 %v176_v32, %v64_v33 }
  0x8c   :  { %v66_v36 = vmul.f32 0.5, %v65_v35 }
  0x8e   :  { %v67_v37 = vsub.f32 1.5, %v66_v36 }
  0x8f   :  { %v178_v38 = vpop.eup %177 }
  0x90   :  { %v68_v39 = vmul.f32 %v176_v32, %v67_v37  ;;  %v74_v42 = vmul.f32 %v178_v38, %v62_v34  ;;  %vm80_vm5 = vweird.f32 %v178_v38 }
  0x91   :  { %vm81_vm8 = vmor %vm79_vm7, %vm80_vm5 }
  0x92   :  { %v72_v43 = vsel %vm71_vm4, %v176_v32, %v68_v39  ;;  %v75_v46 = vmul.f32 %v178_v38, %v74_v42 }
  0x93   :  { %v83_v45 = vmul.f32 %v72_v43, %v59_v40 }
  0x94   :  { %v76_v48 = vmul.f32 0.5, %v75_v46 }
  0x95   :  { %v89_v47 = vmul.f32 %v170_v41, %v83_v45 }
  0x96   :  { %v77_v50 = vsub.f32 1.5, %v76_v48 }
  0x97   :  { %v95_v49 = vadd.f32 %v171_v44, %v89_v47 }
  0x98   :  { %v78_v52 = vmul.f32 %v178_v38, %v77_v50 }
  0x99   :  { %v97_v51 = vpack.c.bf16 %v95_v49, %v95_v49 }
  0x9a   :  { %v82_v54 = vsel %vm81_vm8, %v178_v38, %v78_v52 }
  0x9b   :  { %100 = vst.msk [vmem:[#allocation2] sm:$0xf] %vm99_vm6, %v97_v51  ;;  %v84_v55 = vmul.f32 %v82_v54, %v60_v53 }
  0x9d   :  { %v90_v56 = vmul.f32 %v170_v41, %v84_v55 }
  0x9f   :  { %v96_v57 = vadd.f32 %v171_v44, %v90_v56 }
  0xa1   :  { %v98_v58 = vpack.c.bf16 %v96_v57, %v96_v57 }
  0xa3   :  { %101 = vst.msk [vmem:[#allocation2 + $0x4] sm:$0xf] %vm99_vm6, %v98_v58 }
  0xaa   :  { %v166_v59 = vld [vmem:[#allocation2] sm:$0xff] }
  0xab   :  { %165 = vmatmul.msk.bf16.vlgmr.msra.gmra.mxu0 %vm27_vm0, %v166_v59 }
 0x128   :  { %v142_v61 = vpop.f32.mrf.mxu0 }
 0x129   :  { %v143_v62 = vadd.f32 %v172_v60, %v142_v61 }
 0x12b   :  { %147 = vst [vmem:[%s253_s5] sm:$0xff] %v143_v62 }
 0x130   :  { %v144_v63 = vpop.f32.mrf.mxu0 }
 0x131   :  { %v145_v0 = vadd.f32 %v172_v60, %v144_v63 }
 0x133   :  { %148 = vst [vmem:[%s253_s5 + $0x8] sm:$0xff] %v145_v0 }

</bundles_post_ra>
